<compile_context>
chip_gen: v7x
topology: tpu7x:2x2x1
jax: 0.10.0
libtpu: 0.0.40
codegen_flags: <defaults>
</compile_context>

<pallas_src>
import math

import jax
import jax.numpy as jnp
from jax.experimental import pallas as pl
from jax.experimental.pallas import tpu as pltpu

_LANE = 128      # vreg lane width (last-dim tile)
_SUBLANE = 8     # vreg sublane count for 32-bit dtypes


def _copy_kernel(x_ref, o_ref):
    # The entire forward pass of `Decoder`: identity.
    o_ref[...] = x_ref[...]


def _plan_rows_per_block(n_rows: int, itemsize: int) -> int:
    """Rows per block for the (n_rows, 128) lane-dense slab.

    Returns either a sublane-aligned row count (so the BlockSpec satisfies the
    (8, 128) divisibility rule and the cdiv tail block is legal/masked) or
    n_rows itself (single full-extent block, always legal).

    Targets ~2 MiB blocks but keeps >= ~16 grid steps for large slabs so the
    auto-pipeline overlaps input/output DMAs and both v7x TCs get several
    steps each.
    """
    # Sub-32-bit dtypes pack along sublanes; align row blocks to the native tile.
    sublane_align = _SUBLANE * max(1, 4 // max(1, itemsize))
    row_bytes = _LANE * itemsize

    target_block_bytes = 2 * 1024 * 1024
    rows = max(sublane_align, target_block_bytes // row_bytes)

    # Prefer pipeline depth over giant blocks on large slabs.
    depth_rows = n_rows // 16
    if depth_rows >= sublane_align:
        rows = min(rows, depth_rows)

    rows = max(sublane_align, (rows // sublane_align) * sublane_align)
    if rows >= n_rows:
        return n_rows  # single full-extent block
    return rows


def decoder_forward(x: jnp.ndarray) -> jnp.ndarray:
    """Identity forward pass of `Decoder`, run as a lane-dense Pallas copy kernel."""
    orig_shape = x.shape
    dtype = x.dtype
    n = math.prod(orig_shape) if orig_shape else 1
    if n == 0:
        return x
    itemsize = jnp.dtype(dtype).itemsize

    flat = x.reshape(-1)

    # Lane-dense slab: last dim exactly 128 lanes -> unmasked vst, unit-stride DMA.
    padded_n = ((n + _LANE - 1) // _LANE) * _LANE
    if padded_n != n:
        # Only taken for element counts that are not a multiple of 128.
        # TODO(synk): could run the kernel on the aligned prefix and copy the
        # <128-element tail outside to avoid these two extra HBM copies.
        flat = jnp.pad(flat, (0, padded_n - n))
    n_rows = padded_n // _LANE
    slab = flat.reshape(n_rows, _LANE)

    rows_per_block = _plan_rows_per_block(n_rows, itemsize)
    grid = (pl.cdiv(n_rows, rows_per_block),)   # ragged tail block is masked by Pallas
    block = (rows_per_block, _LANE)
    block_bytes = rows_per_block * _LANE * itemsize

    # 2 input + 2 output double-buffers + headroom, capped well below v7x's
    # 64 MiB physical VMEM (plenty of room on v5e/v6e's 128 MiB).
    vmem_limit = int(min(48 * 1024 * 1024,
                         max(4 * block_bytes + (2 << 20), 8 * 1024 * 1024)))

    out = pl.pallas_call(
        _copy_kernel,
        out_shape=jax.ShapeDtypeStruct((n_rows, _LANE), dtype),
        grid_spec=pl.GridSpec(
            grid=grid,
            in_specs=[pl.BlockSpec(block, lambda i: (i, 0))],
            out_specs=pl.BlockSpec(block, lambda i: (i, 0)),
        ),
        compiler_params=pltpu.CompilerParams(
            dimension_semantics=("parallel",),
            vmem_limit_bytes=vmem_limit,
        ),
        cost_estimate=pl.CostEstimate(
            flops=0, transcendentals=0, bytes_accessed=2 * padded_n * itemsize),
        input_output_aliases={0: 0},  # identity: output may reuse the input buffer
    )(slab)

    out_flat = out.reshape(-1)
    if padded_n != n:
        out_flat = out_flat[:n]
    return out_flat.reshape(orig_shape)


class Decoder:
    """JAX/Pallas mirror of the PyTorch `Decoder` module.

    The constructor signature matches the reference module; since its __init__
    defines no layers used in forward, there are no parameters to initialize.
    """

    def __init__(self, num_embeds: int, d_model: int, n_layer: int, h: int, d_ff: int):
        self.num_embeds = num_embeds
        self.d_model = d_model
        self.n_layer = n_layer
        self.h = h
        self.d_ff = d_ff
        # TODO(synk): reference module's forward is identity; no weights to create.

    def __call__(self, x: jnp.ndarray) -> jnp.ndarray:
        return decoder_forward(x)


if __name__ == "__main__":
    key = jax.random.PRNGKey(0)
    k0, k1, k2 = jax.random.split(key, 3)

    # Small (batch, seq, d_model) consistent with the module.
    B, S, D = 2, 8, 32
    x = jax.random.normal(k0, (B, S, D), dtype=jnp.float32)

    model = Decoder(num_embeds=100, d_model=D, n_layer=2, h=4, d_ff=64)
    y = jax.block_until_ready(model(x))
    assert y.shape == x.shape and y.dtype == x.dtype
    assert bool(jnp.array_equal(y, x))

    # Multi-block path (aligned, several grid steps, no padding).
    x1 = jax.random.normal(k1, (4, 128, 256), dtype=jnp.float32)
    y1 = jax.block_until_ready(decoder_forward(x1))
    assert bool(jnp.array_equal(y1, x1))

    # Ragged path (element count not a multiple of 128).
    x2 = jax.random.normal(k2, (3, 5, 7), dtype=jnp.float32)
    y2 = jax.block_until_ready(decoder_forward(x2))
    assert bool(jnp.array_equal(y2, x2))

    print("KERNEL_OK")
</pallas_src>

<mosaic_0001>
module attributes {stable_mosaic.version = 11 : i64} {
  func.func @_copy_kernel(%arg0: i32, %arg1: memref<4x128xf32, #tpu.memory_space<vmem>>, %arg2: memref<4x128xf32, #tpu.memory_space<vmem>>) attributes {dimension_semantics = [#tpu.dimension_semantics<parallel>], iteration_bounds = array<i64: 1>, scalar_prefetch = 0 : i64, scratch_operands = 0 : i64, tpu.core_type = #tpu.core_type<tc>, window_params = [{transform_indices = @transform_0, window_bounds = array<i64: 4, 128>}, {transform_indices = @transform_1, window_bounds = array<i64: 4, 128>}]} {
    %c0 = arith.constant 0 : index
    %c0_0 = arith.constant 0 : index
    %0 = vector.load %arg1[%c0, %c0_0] : memref<4x128xf32, #tpu.memory_space<vmem>>, vector<4x128xf32>
    %c0_1 = arith.constant 0 : index
    %c0_2 = arith.constant 0 : index
    %1 = vector.load %arg2[%c0_1, %c0_2] : memref<4x128xf32, #tpu.memory_space<vmem>>, vector<4x128xf32>
    tpu.vector_store %arg2[%c0_1, %c0_2], %0 {strides = array<i32>} : memref<4x128xf32, #tpu.memory_space<vmem>>, vector<4x128xf32>,
    return
  }
  func.func @transform_0(%arg0: i32) -> (i32, i32) {
    %c0_i32 = arith.constant 0 : i32
    %c0_i32_0 = arith.constant 0 : i32
    return %arg0, %c0_i32 : i32, i32
  }
  func.func @transform_1(%arg0: i32) -> (i32, i32) {
    %c0_i32 = arith.constant 0 : i32
    %c0_i32_0 = arith.constant 0 : i32
    return %arg0, %c0_i32 : i32, i32
  }
}

</mosaic_0001>

<bundles_post_ra>
// kernel: tpu_custom_call.1
= control target key start
LH: loop header
LB: loop body
LE: loop exit
PB: predicated region body
PF: predicated region fallthrough
CT: control target
= control target key end

     0   :  { %6 = vsyncpa [#allocation3], 0  ;;  %s124_s0 = inlined_call_operand.hbm [shape: f32[4,128], index: 0, kind: input, shape index: {}, may-alias: {0,1}]   ;;  %s125_s1 = inlined_call_operand.hbm [shape: f32[4,128], index: 1, kind: output, shape index: {}, may-alias: {0,1}]  }
   0x1   :  { %7 = vsyncpa [#allocation4], 0  ;;  %s88_s6 = smov [#allocation2]   ;;  %s40_s10 = scalar_lea.hbm %s124_s0, 64 }
   0x2   :  { %s14_s7 = sshll.u32 %s88_s6, 4  ;;  %p41_p0 = scmp.ne.s32.totalorder %s124_s0, %s40_s10  ;;  %s15_s7 = int_to_ptr.vmem [resolvable:$true] %s14_s7 }
   0x3   :  { %p44_p1 = scmp.lt.u32.totalorder %s40_s10, %s124_s0 }
   0x5   :  { %p46_p2 = pnand %p44_p1, %p41_p0 }
   0x7   :  { %49 = shalt.err (!%p46_p2)
}
   0x8   :  { %s50_s15 = scalar_lea.vmem %s15_s7, 64  ;;  %p55_p4 = scmp.lt.s32.totalorder %s15_s7, %s15_s7 }
   0x9   :  { %p51_p3 = scmp.ne.s32.totalorder %s15_s7, %s50_s15  ;;  %p56_p5 = scmp.lt.s32.totalorder %s50_s15, %s50_s15 }
   0xb   :  { %p57_p6 = por %p56_p5, %p55_p4 }
   0xd   :  { %p58_p7 = pnand %p57_p6, %p51_p3 }
   0xf   :  { %61 = shalt.err (!%p58_p7)
}
  0x10   :  { %17 = dma.hbm_to_vmem [thread:$0]  %s124_s0, 64, %s15_s7, [#allocation3]  }
  0x11   :  { %84 = dma.done.wait [#allocation3], 64  }
  0x12   :  { %85 = vsyncadd [#allocation3], 4294967232  ;;  %s89_s18 = smov [#allocation5]   ;;  %v21_v0 = vld [vmem:[#allocation2] sm:$0xf] }
  0x13   :  { %s29_s19 = sshll.u32 %s89_s18, 4  ;;  %22 = vst [vmem:[#allocation5] sm:$0xf] %v21_v0  ;;  %s30_s19 = int_to_ptr.vmem [resolvable:$true] %s29_s19 }
  0x14   :  { %s62_s20 = scalar_lea.vmem %s30_s19, 64  ;;  %p67_p9 = scmp.lt.s32.totalorder %s30_s19, %s30_s19 }
  0x15   :  { %p63_p8 = scmp.ne.s32.totalorder %s30_s19, %s62_s20  ;;  %p68_p10 = scmp.lt.s32.totalorder %s62_s20, %s62_s20 }
  0x17   :  { %p69_p11 = por %p68_p10, %p67_p9 }
  0x19   :  { %p70_p12 = pnand %p69_p11, %p63_p8 }
  0x1b   :  { %73 = shalt.err (!%p70_p12)
}
  0x1c   :  { %s74_s23 = scalar_lea.hbm %s125_s1, 64 }
  0x1d   :  { %p75_p13 = scmp.ne.s32.totalorder %s125_s1, %s74_s23  ;;  %p78_p0 = scmp.lt.u32.totalorder %s74_s23, %s125_s1 }
  0x1f   :  { %p80_p1 = pnand %p78_p0, %p75_p13 }
  0x21   :  { %83 = shalt.err (!%p80_p1)
}
  0x22   :  { %32 = dma.vmem_to_hbm [thread:$0]  %s30_s19, 64, %s125_s1, [#allocation4]  }
  0x23   :  { %86 = dma.done.wait [#allocation4], 64  }
  0x24   :  { %87 = vsyncadd [#allocation4], 4294967232 }
  0x25   :  { %36 = vsyncpa [#allocation3], 1 }
  0x26   :  { %37 = vsyncpa [#allocation4], 1 }

</bundles_post_ra>
